<compile_context>
chip_gen: v7x
topology: tpu7x:2x2x1
jax: 0.10.0
libtpu: 0.0.40
codegen_flags: <defaults>
</compile_context>

<pallas_src>
import functools
import numpy as np
import jax
import jax.numpy as jnp
from jax.experimental import pallas as pl
from jax.experimental.pallas import tpu as pltpu


# ----------------------------- Pallas kernels -----------------------------

def _fused_conv3x3_kernel(x_ref, scale_ref, shift_ref, w_ref, b_ref, o_ref, *,
                          apply_bn_relu, concat_input, h, w, cin, cout):
    """x_ref: (1, h+2, w+2, cin) bf16, spatially zero-padded *raw* input.

    Optionally applies folded BN + ReLU, then computes a 3x3 SAME conv as 9
    accumulated matmuls over shifted views (f32 accumulator), and optionally
    appends the raw input channels (DenseNet concat) to the output block.
    """
    xin = x_ref[0]                                        # (h+2, w+2, cin) bf16
    if apply_bn_relu:
        xf = jnp.maximum(
            xin.astype(jnp.float32) * scale_ref[...] + shift_ref[...], 0.0)
        # The conv pads the *activated* tensor with zeros, so re-zero the halo
        # (relu(0*scale + shift) != 0 in general).
        row = jax.lax.broadcasted_iota(jnp.int32, (h + 2, w + 2), 0)
        col = jax.lax.broadcasted_iota(jnp.int32, (h + 2, w + 2), 1)
        interior = (row >= 1) & (row <= h) & (col >= 1) & (col <= w)
        xf = jnp.where(interior[:, :, None], xf, 0.0)
        xa = xf.astype(jnp.bfloat16)
    else:
        xa = xin

    acc = jnp.zeros((h * w, cout), jnp.float32)
    t = 0
    for di in range(3):
        for dj in range(3):
            a = xa[di:di + h, dj:dj + w, :].reshape(h * w, cin)
            acc = acc + jnp.dot(a, w_ref[t], preferred_element_type=jnp.float32)
            t += 1
    y = (acc + b_ref[...]).reshape(h, w, cout).astype(o_ref.dtype)
    if concat_input:
        # torch.cat([layer(x), x], dim=1)  ==  channel-last concat [y, x]
        y = jnp.concatenate([y, xin[1:1 + h, 1:1 + w, :]], axis=-1)
    o_ref[0] = y


def _fused_conv1x1_kernel(x_ref, scale_ref, shift_ref, w_ref, b_ref, o_ref, *,
                          apply_bn_relu):
    """x_ref: (TM, Cin) bf16.  Optional folded BN+ReLU prologue, then matmul."""
    x = x_ref[...]
    if apply_bn_relu:
        a = jnp.maximum(
            x.astype(jnp.float32) * scale_ref[...] + shift_ref[...], 0.0
        ).astype(jnp.bfloat16)
    else:
        a = x
    y = jnp.dot(a, w_ref[...], preferred_element_type=jnp.float32) + b_ref[...]
    o_ref[...] = y.astype(o_ref.dtype)


# ----------------------------- kernel wrappers -----------------------------

def _pick_tm(m, cap=512):
    """Largest row tile <= cap that evenly divides m (fallback: single block).

    Avoids row padding + output slicing, which cost extra HBM passes.
    """
    if m <= cap:
        return m
    tm = cap
    while tm >= 8:
        if m % tm == 0:
            return tm
        tm //= 2
    return m


def conv3x3_fused(x, p, *, apply_bn_relu, concat_input):
    """x: (N, H, W, Cin) bf16.  p: prepared params with scale/shift/w/b."""
    n, h, wd, cin = x.shape
    cout = p["w"].shape[2]
    cout_total = cout + (cin if concat_input else 0)
    xp = jnp.pad(x, ((0, 0), (1, 1), (1, 1), (0, 0)))     # spatial halo only
    kern = functools.partial(
        _fused_conv3x3_kernel, apply_bn_relu=apply_bn_relu,
        concat_input=concat_input, h=h, w=wd, cin=cin, cout=cout)
    return pl.pallas_call(
        kern,
        out_shape=jax.ShapeDtypeStruct((n, h, wd, cout_total), jnp.bfloat16),
        grid=(n,),
        in_specs=[pl.BlockSpec((1, h + 2, wd + 2, cin), lambda i: (i, 0, 0, 0)),
                  pl.BlockSpec((1, cin), lambda i: (0, 0)),
                  pl.BlockSpec((1, cin), lambda i: (0, 0)),
                  pl.BlockSpec((9, cin, cout), lambda i: (0, 0, 0)),
                  pl.BlockSpec((1, cout), lambda i: (0, 0))],
        out_specs=pl.BlockSpec((1, h, wd, cout_total), lambda i: (i, 0, 0, 0)),
        compiler_params=pltpu.CompilerParams(dimension_semantics=("parallel",)),
    )(xp, p["scale"], p["shift"], p["w"], p["b"])


def conv1x1_fused(x, p, *, apply_bn_relu):
    """x: (N, H, W, Cin) bf16 -> (N, H, W, Cout) bf16."""
    n, h, wd, cin = x.shape
    cout = p["w"].shape[1]
    m = n * h * wd
    tm = _pick_tm(m)
    kern = functools.partial(_fused_conv1x1_kernel, apply_bn_relu=apply_bn_relu)
    y = pl.pallas_call(
        kern,
        out_shape=jax.ShapeDtypeStruct((m, cout), jnp.bfloat16),
        grid=(m // tm,),
        in_specs=[pl.BlockSpec((tm, cin), lambda i: (i, 0)),
                  pl.BlockSpec((1, cin), lambda i: (0, 0)),
                  pl.BlockSpec((1, cin), lambda i: (0, 0)),
                  pl.BlockSpec((cin, cout), lambda i: (0, 0)),
                  pl.BlockSpec((1, cout), lambda i: (0, 0))],
        out_specs=pl.BlockSpec((tm, cout), lambda i: (i, 0)),
        compiler_params=pltpu.CompilerParams(dimension_semantics=("parallel",)),
    )(x.reshape(m, cin), p["scale"], p["shift"], p["w"], p["b"])
    return y.reshape(n, h, wd, cout)


# ---------------------------- layer primitives -----------------------------

def dense_block(x, plist):
    for p in plist:
        # Kernel directly writes concat([conv3x3(relu(bn(x))), x], channel-last).
        x = conv3x3_fused(x, p, apply_bn_relu=True, concat_input=True)
    return x


def transition_down(x, p):
    # MaxPool2d(kernel=1, stride=2) == stride-2 subsample; it commutes with the
    # per-pixel BN/ReLU/1x1-conv, so subsample first (4x fewer matmul rows).
    return conv1x1_fused(x[:, ::2, ::2, :], p, apply_bn_relu=True)


def transition_up(x, skip, p):
    n, h, wd, cin = x.shape
    cout = p["w"].shape[1] // 4
    y = conv1x1_fused(x, p, apply_bn_relu=False)           # (n, h, wd, 4*cout)
    y = y.reshape(n, h, wd, 2, 2, cout)
    y = jnp.transpose(y, (0, 1, 3, 2, 4, 5)).reshape(n, 2 * h, 2 * wd, cout)
    return jnp.concatenate([y, skip], axis=-1)


# ------------------------------- parameters --------------------------------
# Raw params are generated in PyTorch layout, then folded/transposed/cast once.

def _conv_p(key, cout, cin, kh, kw):
    k1, k2 = jax.random.split(key)
    fan_in = cin * kh * kw
    return {"w": jax.random.normal(k1, (cout, cin, kh, kw), jnp.float32) / np.sqrt(fan_in),
            "b": 0.01 * jax.random.normal(k2, (cout,), jnp.float32)}


def _convT_p(key, cin, cout):
    k1, k2 = jax.random.split(key)
    return {"w": jax.random.normal(k1, (cin, cout, 2, 2), jnp.float32) / np.sqrt(cin * 4),
            "b": 0.01 * jax.random.normal(k2, (cout,), jnp.float32)}


def _bn_p(key, c):
    k1, k2, k3, k4 = jax.random.split(key, 4)
    return {"gamma": 1.0 + 0.1 * jax.random.normal(k1, (c,), jnp.float32),
            "beta": 0.05 * jax.random.normal(k2, (c,), jnp.float32),
            "mean": 0.1 * jax.random.normal(k3, (c,), jnp.float32),
            "var": jax.random.uniform(k4, (c,), jnp.float32, 0.5, 1.5)}


def _brc_p(key, cin, cout, ksize):
    k1, k2 = jax.random.split(key)
    return {"bn": _bn_p(k1, cin), "conv": _conv_p(k2, cout, cin, ksize, ksize)}


def _dense_p(key, cin, growth, layers):
    ps = []
    for i in range(layers):
        ps.append(_brc_p(jax.random.fold_in(key, i), cin, growth, 3))
        cin += growth
    return ps


def init_params(key, n_filters_first_conv, n_pool, growth_rate, dblock_layers, num_classes):
    counter = [0]

    def nk():
        counter[0] += 1
        return jax.random.fold_in(key, counter[0])

    params = {"conv1": _conv_p(nk(), n_filters_first_conv, 3, 3, 3)}
    n_filters = n_filters_first_conv
    down_dense, down_td, track = [], [], []
    for k in range(n_pool):
        down_dense.append(_dense_p(nk(), n_filters, growth_rate, dblock_layers[k]))
        n_filters += dblock_layers[k] * growth_rate
        down_td.append(_brc_p(nk(), n_filters, n_filters, 1))
        track.append(n_filters)
    params["down_dense"], params["down_td"] = down_dense, down_td

    params["bottleneck"] = _dense_p(nk(), n_filters, growth_rate, dblock_layers[n_pool])
    track.append(n_filters + dblock_layers[n_pool] * growth_rate)
    track = track[::-1]
    n_filters += dblock_layers[n_pool] * growth_rate
    flip = dblock_layers[::-1]

    up_tu, up_dense = [], []
    for k in range(n_pool):
        up_tu.append(_convT_p(nk(), n_filters, growth_rate * flip[k]))
        up_dense.append(_dense_p(nk(), track[k + 1] + growth_rate * flip[k],
                                 growth_rate, flip[k + 1]))
        n_filters = track[k + 1] + growth_rate * flip[k] + flip[k + 1] * growth_rate
    params["up_tu"], params["up_dense"] = up_tu, up_dense
    params["out"] = _conv_p(nk(), num_classes, n_filters, 1, 1)
    return params


# ----------------- one-time parameter preprocessing (hoisted) ---------------

def _fold_bn(bn):
    scale = bn["gamma"] * jax.lax.rsqrt(bn["var"] + 1e-5)
    shift = bn["beta"] - bn["mean"] * scale
    return scale, shift


def _prep_brc3(p):                       # BN -> ReLU -> Conv3x3
    cout, cin, kh, kw = p["conv"]["w"].shape
    scale, shift = _fold_bn(p["bn"])
    return {"scale": scale.reshape(1, cin).astype(jnp.float32),
            "shift": shift.reshape(1, cin).astype(jnp.float32),
            "w": jnp.transpose(p["conv"]["w"], (2, 3, 1, 0)).reshape(kh * kw, cin, cout).astype(jnp.bfloat16),
            "b": p["conv"]["b"].reshape(1, cout).astype(jnp.float32)}


def _prep_plain3(p):                     # Conv3x3 without BN/ReLU (conv1)
    cout, cin, kh, kw = p["w"].shape
    return {"scale": jnp.ones((1, cin), jnp.float32),
            "shift": jnp.zeros((1, cin), jnp.float32),
            "w": jnp.transpose(p["w"], (2, 3, 1, 0)).reshape(kh * kw, cin, cout).astype(jnp.bfloat16),
            "b": p["b"].reshape(1, cout).astype(jnp.float32)}


def _prep_brc1(p):                       # BN -> ReLU -> Conv1x1 (transition down)
    cout, cin, _, _ = p["conv"]["w"].shape
    scale, shift = _fold_bn(p["bn"])
    return {"scale": scale.reshape(1, cin).astype(jnp.float32),
            "shift": shift.reshape(1, cin).astype(jnp.float32),
            "w": jnp.transpose(p["conv"]["w"][:, :, 0, 0], (1, 0)).astype(jnp.bfloat16),
            "b": p["conv"]["b"].reshape(1, cout).astype(jnp.float32)}


def _prep_plain1(p):                     # Conv1x1 without BN/ReLU (classifier)
    cout, cin, _, _ = p["w"].shape
    return {"scale": jnp.ones((1, cin), jnp.float32),
            "shift": jnp.zeros((1, cin), jnp.float32),
            "w": jnp.transpose(p["w"][:, :, 0, 0], (1, 0)).astype(jnp.bfloat16),
            "b": p["b"].reshape(1, cout).astype(jnp.float32)}


def _prep_convT(p):                      # ConvTranspose2d(kernel=2, stride=2)
    cin, cout = p["w"].shape[0], p["w"].shape[1]
    return {"scale": jnp.ones((1, cin), jnp.float32),
            "shift": jnp.zeros((1, cin), jnp.float32),
            "w": jnp.transpose(p["w"], (0, 2, 3, 1)).reshape(cin, 4 * cout).astype(jnp.bfloat16),
            "b": jnp.tile(p["b"], 4).reshape(1, 4 * cout).astype(jnp.float32)}


def prepare_params(params):
    return {
        "conv1": _prep_plain3(params["conv1"]),
        "down_dense": [[_prep_brc3(p) for p in blk] for blk in params["down_dense"]],
        "down_td": [_prep_brc1(p) for p in params["down_td"]],
        "bottleneck": [_prep_brc3(p) for p in params["bottleneck"]],
        "up_tu": [_prep_convT(p) for p in params["up_tu"]],
        "up_dense": [[_prep_brc3(p) for p in blk] for blk in params["up_dense"]],
        "out": _prep_plain1(params["out"]),
    }


# -------------------------------- forward ----------------------------------

def fcdensenet_forward(prep, x_nchw):
    x = jnp.transpose(x_nchw, (0, 2, 3, 1)).astype(jnp.bfloat16)   # NCHW -> NHWC
    x = conv3x3_fused(x, prep["conv1"], apply_bn_relu=False, concat_input=False)
    skips = []
    for p_dense, p_td in zip(prep["down_dense"], prep["down_td"]):
        x = dense_block(x, p_dense)
        skips.append(x)
        x = transition_down(x, p_td)
    x = dense_block(x, prep["bottleneck"])
    skips = skips[::-1]
    for idx, (p_dense, p_tu) in enumerate(zip(prep["up_dense"], prep["up_tu"])):
        x = transition_up(x, skips[idx], p_tu)
        x = dense_block(x, p_dense)
    x = conv1x1_fused(x, prep["out"], apply_bn_relu=False)
    return jnp.transpose(x, (0, 3, 1, 2)).astype(jnp.float32)       # back to NCHW


# ----------------------------- sanity checks --------------------------------

def _check_conv3x3_plain():
    k = jax.random.PRNGKey(1)
    x = jax.random.normal(k, (2, 8, 8, 5), jnp.float32).astype(jnp.bfloat16)
    w = jax.random.normal(jax.random.fold_in(k, 1), (7, 5, 3, 3), jnp.float32) / 3.0
    b = 0.1 * jax.random.normal(jax.random.fold_in(k, 2), (7,), jnp.float32)
    got = conv3x3_fused(x, _prep_plain3({"w": w, "b": b}),
                        apply_bn_relu=False, concat_input=False)
    ref = jax.lax.conv_general_dilated(
        x, jnp.transpose(w, (2, 3, 1, 0)).astype(jnp.bfloat16), (1, 1), "SAME",
        dimension_numbers=("NHWC", "HWIO", "NHWC"),
        preferred_element_type=jnp.float32) + b
    np.testing.assert_allclose(
        np.asarray(got.astype(jnp.float32)),
        np.asarray(ref.astype(jnp.bfloat16).astype(jnp.float32)),
        rtol=2e-2, atol=2e-2)


def _check_conv3x3_bn_concat():
    k = jax.random.PRNGKey(2)
    n, h, w, cin, cout = 2, 8, 8, 6, 5
    x = jax.random.normal(k, (n, h, w, cin), jnp.float32).astype(jnp.bfloat16)
    wt = jax.random.normal(jax.random.fold_in(k, 1), (cout, cin, 3, 3), jnp.float32) / 3.0
    b = 0.1 * jax.random.normal(jax.random.fold_in(k, 2), (cout,), jnp.float32)
    bn = _bn_p(jax.random.fold_in(k, 3), cin)
    got = conv3x3_fused(x, _prep_brc3({"bn": bn, "conv": {"w": wt, "b": b}}),
                        apply_bn_relu=True, concat_input=True)
    scale, shift = _fold_bn(bn)
    a = jnp.maximum(x.astype(jnp.float32) * scale + shift, 0.0).astype(jnp.bfloat16)
    conv = jax.lax.conv_general_dilated(
        a, jnp.transpose(wt, (2, 3, 1, 0)).astype(jnp.bfloat16), (1, 1), "SAME",
        dimension_numbers=("NHWC", "HWIO", "NHWC"),
        preferred_element_type=jnp.float32) + b
    ref = jnp.concatenate([conv.astype(jnp.bfloat16), x], axis=-1).astype(jnp.float32)
    np.testing.assert_allclose(np.asarray(got.astype(jnp.float32)), np.asarray(ref),
                               rtol=2e-2, atol=2e-2)


# ---------------------------------- main ------------------------------------

if __name__ == "__main__":
    # Small FCDenseNet configuration (same architecture recipe as the PyTorch
    # module, scaled down for a quick synthetic run).
    cfg = dict(n_filters_first_conv=8, n_pool=2, growth_rate=4,
               dblock_layers=[2, 2, 3], num_classes=2)

    key = jax.random.PRNGKey(0)
    params = init_params(jax.random.fold_in(key, 123), **cfg)
    prep = prepare_params(params)   # one-time: BN folding, transposes, bf16 casts
    x = jax.random.normal(jax.random.fold_in(key, 7), (2, 3, 16, 16), jnp.float32)

    _check_conv3x3_plain()
    _check_conv3x3_bn_concat()

    fwd = jax.jit(fcdensenet_forward)
    y = jax.block_until_ready(fwd(prep, x))

    assert y.shape == (2, cfg["num_classes"], 16, 16), y.shape
    assert bool(jnp.all(jnp.isfinite(y)))
    print("KERNEL_OK")
</pallas_src>

<mosaic_0001>
module attributes {stable_mosaic.version = 11 : i64} {
  func.func @_fused_conv3x3_kernel(%arg0: i32, %arg1: memref<1x10x10x5xbf16, #tpu.memory_space<vmem>>, %arg2: memref<1x5xf32, #tpu.memory_space<vmem>>, %arg3: memref<1x5xf32, #tpu.memory_space<vmem>>, %arg4: memref<9x5x7xbf16, #tpu.memory_space<vmem>>, %arg5: memref<1x7xf32, #tpu.memory_space<vmem>>, %arg6: memref<1x8x8x7xbf16, #tpu.memory_space<vmem>>) attributes {dimension_semantics = [#tpu.dimension_semantics<parallel>], iteration_bounds = array<i64: 2>, scalar_prefetch = 0 : i64, scratch_operands = 0 : i64, tpu.core_type = #tpu.core_type<tc>, window_params = [{transform_indices = @transform_0, window_bounds = array<i64: 1, 10, 10, 5>}, {pipeline_mode = #tpu.pipeline_mode<synchronous>, transform_indices = @transform_1, window_bounds = array<i64: 1, 5>}, {pipeline_mode = #tpu.pipeline_mode<synchronous>, transform_indices = @transform_2, window_bounds = array<i64: 1, 5>}, {pipeline_mode = #tpu.pipeline_mode<synchronous>, transform_indices = @transform_3, window_bounds = array<i64: 9, 5, 7>}, {pipeline_mode = #tpu.pipeline_mode<synchronous>, transform_indices = @transform_4, window_bounds = array<i64: 1, 7>}, {transform_indices = @transform_5, window_bounds = array<i64: 1, 8, 8, 7>}]} {
    %c0 = arith.constant 0 : index
    %c0_0 = arith.constant 0 : index
    %c0_1 = arith.constant 0 : index
    %c0_2 = arith.constant 0 : index
    %0 = vector.load %arg1[%c0, %c0_0, %c0_1, %c0_2] : memref<1x10x10x5xbf16, #tpu.memory_space<vmem>>, vector<1x10x10x5xbf16>
    %1 = vector.shape_cast %0 : vector<1x10x10x5xbf16> to vector<10x10x5xbf16>
    %cst = arith.constant 0.000000e+00 : f32
    %2 = vector.broadcast %cst : f32 to vector<64x7xf32>
    %3 = vector.extract_strided_slice %1 {offsets = [0, 0, 0], sizes = [8, 8, 5], strides = [1, 1, 1]} : vector<10x10x5xbf16> to vector<8x8x5xbf16>
    %4 = vector.shape_cast %3 : vector<8x8x5xbf16> to vector<64x5xbf16>
    %c0_3 = arith.constant 0 : index
    %c0_4 = arith.constant 0 : index
    %c0_5 = arith.constant 0 : index
    %5 = vector.load %arg4[%c0_3, %c0_4, %c0_5] : memref<9x5x7xbf16, #tpu.memory_space<vmem>>, vector<1x5x7xbf16>
    %6 = vector.shape_cast %5 : vector<1x5x7xbf16> to vector<5x7xbf16>
    %cst_6 = arith.constant dense<0.000000e+00> : vector<64x7xf32>
    %7 = tpu.matmul %4, %6, %cst_6 {dimension_numbers = #tpu.dot_dimension_numbers<[1], [0], [0], [1], [0, 0, 1, 1], [], []>} : vector<64x5xbf16>, vector<5x7xbf16>, vector<64x7xf32> -> vector<64x7xf32>
    %8 = arith.addf %2, %7 : vector<64x7xf32>
    %9 = vector.extract_strided_slice %1 {offsets = [0, 1, 0], sizes = [8, 8, 5], strides = [1, 1, 1]} : vector<10x10x5xbf16> to vector<8x8x5xbf16>
    %10 = vector.shape_cast %9 : vector<8x8x5xbf16> to vector<64x5xbf16>
    %c1 = arith.constant 1 : index
    %c0_7 = arith.constant 0 : index
    %c0_8 = arith.constant 0 : index
    %11 = vector.load %arg4[%c1, %c0_7, %c0_8] : memref<9x5x7xbf16, #tpu.memory_space<vmem>>, vector<1x5x7xbf16>
    %12 = vector.shape_cast %11 : vector<1x5x7xbf16> to vector<5x7xbf16>
    %cst_9 = arith.constant dense<0.000000e+00> : vector<64x7xf32>
    %13 = tpu.matmul %10, %12, %cst_9 {dimension_numbers = #tpu.dot_dimension_numbers<[1], [0], [0], [1], [0, 0, 1, 1], [], []>} : vector<64x5xbf16>, vector<5x7xbf16>, vector<64x7xf32> -> vector<64x7xf32>
    %14 = arith.addf %8, %13 : vector<64x7xf32>
    %15 = vector.extract_strided_slice %1 {offsets = [0, 2, 0], sizes = [8, 8, 5], strides = [1, 1, 1]} : vector<10x10x5xbf16> to vector<8x8x5xbf16>
    %16 = vector.shape_cast %15 : vector<8x8x5xbf16> to vector<64x5xbf16>
    %c2 = arith.constant 2 : index
    %c0_10 = arith.constant 0 : index
    %c0_11 = arith.constant 0 : index
    %17 = vector.load %arg4[%c2, %c0_10, %c0_11] : memref<9x5x7xbf16, #tpu.memory_space<vmem>>, vector<1x5x7xbf16>
    %18 = vector.shape_cast %17 : vector<1x5x7xbf16> to vector<5x7xbf16>
    %cst_12 = arith.constant dense<0.000000e+00> : vector<64x7xf32>
    %19 = tpu.matmul %16, %18, %cst_12 {dimension_numbers = #tpu.dot_dimension_numbers<[1], [0], [0], [1], [0, 0, 1, 1], [], []>} : vector<64x5xbf16>, vector<5x7xbf16>, vector<64x7xf32> -> vector<64x7xf32>
    %20 = arith.addf %14, %19 : vector<64x7xf32>
    %21 = vector.extract_strided_slice %1 {offsets = [1, 0, 0], sizes = [8, 8, 5], strides = [1, 1, 1]} : vector<10x10x5xbf16> to vector<8x8x5xbf16>
    %22 = vector.shape_cast %21 : vector<8x8x5xbf16> to vector<64x5xbf16>
    %c3 = arith.constant 3 : index
    %c0_13 = arith.constant 0 : index
    %c0_14 = arith.constant 0 : index
    %23 = vector.load %arg4[%c3, %c0_13, %c0_14] : memref<9x5x7xbf16, #tpu.memory_space<vmem>>, vector<1x5x7xbf16>
    %24 = vector.shape_cast %23 : vector<1x5x7xbf16> to vector<5x7xbf16>
    %cst_15 = arith.constant dense<0.000000e+00> : vector<64x7xf32>
    %25 = tpu.matmul %22, %24, %cst_15 {dimension_numbers = #tpu.dot_dimension_numbers<[1], [0], [0], [1], [0, 0, 1, 1], [], []>} : vector<64x5xbf16>, vector<5x7xbf16>, vector<64x7xf32> -> vector<64x7xf32>
    %26 = arith.addf %20, %25 : vector<64x7xf32>
    %27 = vector.extract_strided_slice %1 {offsets = [1, 1, 0], sizes = [8, 8, 5], strides = [1, 1, 1]} : vector<10x10x5xbf16> to vector<8x8x5xbf16>
    %28 = vector.shape_cast %27 : vector<8x8x5xbf16> to vector<64x5xbf16>
    %c4 = arith.constant 4 : index
    %c0_16 = arith.constant 0 : index
    %c0_17 = arith.constant 0 : index
    %29 = vector.load %arg4[%c4, %c0_16, %c0_17] : memref<9x5x7xbf16, #tpu.memory_space<vmem>>, vector<1x5x7xbf16>
    %30 = vector.shape_cast %29 : vector<1x5x7xbf16> to vector<5x7xbf16>
    %cst_18 = arith.constant dense<0.000000e+00> : vector<64x7xf32>
    %31 = tpu.matmul %28, %30, %cst_18 {dimension_numbers = #tpu.dot_dimension_numbers<[1], [0], [0], [1], [0, 0, 1, 1], [], []>} : vector<64x5xbf16>, vector<5x7xbf16>, vector<64x7xf32> -> vector<64x7xf32>
    %32 = arith.addf %26, %31 : vector<64x7xf32>
    %33 = vector.extract_strided_slice %1 {offsets = [1, 2, 0], sizes = [8, 8, 5], strides = [1, 1, 1]} : vector<10x10x5xbf16> to vector<8x8x5xbf16>
    %34 = vector.shape_cast %33 : vector<8x8x5xbf16> to vector<64x5xbf16>
    %c5 = arith.constant 5 : index
    %c0_19 = arith.constant 0 : index
    %c0_20 = arith.constant 0 : index
    %35 = vector.load %arg4[%c5, %c0_19, %c0_20] : memref<9x5x7xbf16, #tpu.memory_space<vmem>>, vector<1x5x7xbf16>
    %36 = vector.shape_cast %35 : vector<1x5x7xbf16> to vector<5x7xbf16>
    %cst_21 = arith.constant dense<0.000000e+00> : vector<64x7xf32>
    %37 = tpu.matmul %34, %36, %cst_21 {dimension_numbers = #tpu.dot_dimension_numbers<[1], [0], [0], [1], [0, 0, 1, 1], [], []>} : vector<64x5xbf16>, vector<5x7xbf16>, vector<64x7xf32> -> vector<64x7xf32>
    %38 = arith.addf %32, %37 : vector<64x7xf32>
    %39 = vector.extract_strided_slice %1 {offsets = [2, 0, 0], sizes = [8, 8, 5], strides = [1, 1, 1]} : vector<10x10x5xbf16> to vector<8x8x5xbf16>
    %40 = vector.shape_cast %39 : vector<8x8x5xbf16> to vector<64x5xbf16>
    %c6 = arith.constant 6 : index
    %c0_22 = arith.constant 0 : index
    %c0_23 = arith.constant 0 : index
    %41 = vector.load %arg4[%c6, %c0_22, %c0_23] : memref<9x5x7xbf16, #tpu.memory_space<vmem>>, vector<1x5x7xbf16>
    %42 = vector.shape_cast %41 : vector<1x5x7xbf16> to vector<5x7xbf16>
    %cst_24 = arith.constant dense<0.000000e+00> : vector<64x7xf32>
    %43 = tpu.matmul %40, %42, %cst_24 {dimension_numbers = #tpu.dot_dimension_numbers<[1], [0], [0], [1], [0, 0, 1, 1], [], []>} : vector<64x5xbf16>, vector<5x7xbf16>, vector<64x7xf32> -> vector<64x7xf32>
    %44 = arith.addf %38, %43 : vector<64x7xf32>
    %45 = vector.extract_strided_slice %1 {offsets = [2, 1, 0], sizes = [8, 8, 5], strides = [1, 1, 1]} : vector<10x10x5xbf16> to vector<8x8x5xbf16>
    %46 = vector.shape_cast %45 : vector<8x8x5xbf16> to vector<64x5xbf16>
    %c7 = arith.constant 7 : index
    %c0_25 = arith.constant 0 : index
    %c0_26 = arith.constant 0 : index
    %47 = vector.load %arg4[%c7, %c0_25, %c0_26] : memref<9x5x7xbf16, #tpu.memory_space<vmem>>, vector<1x5x7xbf16>
    %48 = vector.shape_cast %47 : vector<1x5x7xbf16> to vector<5x7xbf16>
    %cst_27 = arith.constant dense<0.000000e+00> : vector<64x7xf32>
    %49 = tpu.matmul %46, %48, %cst_27 {dimension_numbers = #tpu.dot_dimension_numbers<[1], [0], [0], [1], [0, 0, 1, 1], [], []>} : vector<64x5xbf16>, vector<5x7xbf16>, vector<64x7xf32> -> vector<64x7xf32>
    %50 = arith.addf %44, %49 : vector<64x7xf32>
    %51 = vector.extract_strided_slice %1 {offsets = [2, 2, 0], sizes = [8, 8, 5], strides = [1, 1, 1]} : vector<10x10x5xbf16> to vector<8x8x5xbf16>
    %52 = vector.shape_cast %51 : vector<8x8x5xbf16> to vector<64x5xbf16>
    %c8 = arith.constant 8 : index
    %c0_28 = arith.constant 0 : index
    %c0_29 = arith.constant 0 : index
    %53 = vector.load %arg4[%c8, %c0_28, %c0_29] : memref<9x5x7xbf16, #tpu.memory_space<vmem>>, vector<1x5x7xbf16>
    %54 = vector.shape_cast %53 : vector<1x5x7xbf16> to vector<5x7xbf16>
    %cst_30 = arith.constant dense<0.000000e+00> : vector<64x7xf32>
    %55 = tpu.matmul %52, %54, %cst_30 {dimension_numbers = #tpu.dot_dimension_numbers<[1], [0], [0], [1], [0, 0, 1, 1], [], []>} : vector<64x5xbf16>, vector<5x7xbf16>, vector<64x7xf32> -> vector<64x7xf32>
    %56 = arith.addf %50, %55 : vector<64x7xf32>
    %c0_31 = arith.constant 0 : index
    %c0_32 = arith.constant 0 : index
    %57 = vector.load %arg5[%c0_31, %c0_32] : memref<1x7xf32, #tpu.memory_space<vmem>>, vector<1x7xf32>
    %58 = vector.broadcast %57 : vector<1x7xf32> to vector<64x7xf32>
    %59 = arith.addf %56, %58 : vector<64x7xf32>
    %60 = vector.shape_cast %59 : vector<64x7xf32> to vector<8x8x7xf32>
    %61 = arith.truncf %60 : vector<8x8x7xf32> to vector<8x8x7xbf16>
    %c0_33 = arith.constant 0 : index
    %c0_34 = arith.constant 0 : index
    %c0_35 = arith.constant 0 : index
    %c0_36 = arith.constant 0 : index
    %62 = vector.load %arg6[%c0_33, %c0_34, %c0_35, %c0_36] : memref<1x8x8x7xbf16, #tpu.memory_space<vmem>>, vector<1x8x8x7xbf16>
    %63 = vector.shape_cast %62 : vector<1x8x8x7xbf16> to vector<8x8x7xbf16>
    %64 = vector.shape_cast %61 : vector<8x8x7xbf16> to vector<1x8x8x7xbf16>
    tpu.vector_store %arg6[%c0_33, %c0_34, %c0_35, %c0_36], %64 {strides = array<i32>} : memref<1x8x8x7xbf16, #tpu.memory_space<vmem>>, vector<1x8x8x7xbf16>,
    return
  }
  func.func @transform_0(%arg0: i32) -> (i32, i32, i32, i32) {
    %c0_i32 = arith.constant 0 : i32
    %c0_i32_0 = arith.constant 0 : i32
    %c0_i32_1 = arith.constant 0 : i32
    %c0_i32_2 = arith.constant 0 : i32
    return %arg0, %c0_i32, %c0_i32_0, %c0_i32_1 : i32, i32, i32, i32
  }
  func.func @transform_1(%arg0: i32) -> (i32, i32) {
    %c0_i32 = arith.constant 0 : i32
    %c0_i32_0 = arith.constant 0 : i32
    %c0_i32_1 = arith.constant 0 : i32
    return %c0_i32, %c0_i32_0 : i32, i32
  }
  func.func @transform_2(%arg0: i32) -> (i32, i32) {
    %c0_i32 = arith.constant 0 : i32
    %c0_i32_0 = arith.constant 0 : i32
    %c0_i32_1 = arith.constant 0 : i32
    return %c0_i32, %c0_i32_0 : i32, i32
  }
  func.func @transform_3(%arg0: i32) -> (i32, i32, i32) {
    %c0_i32 = arith.constant 0 : i32
    %c0_i32_0 = arith.constant 0 : i32
    %c0_i32_1 = arith.constant 0 : i32
    %c0_i32_2 = arith.constant 0 : i32
    return %c0_i32, %c0_i32_0, %c0_i32_1 : i32, i32, i32
  }
  func.func @transform_4(%arg0: i32) -> (i32, i32) {
    %c0_i32 = arith.constant 0 : i32
    %c0_i32_0 = arith.constant 0 : i32
    %c0_i32_1 = arith.constant 0 : i32
    return %c0_i32, %c0_i32_0 : i32, i32
  }
  func.func @transform_5(%arg0: i32) -> (i32, i32, i32, i32) {
    %c0_i32 = arith.constant 0 : i32
    %c0_i32_0 = arith.constant 0 : i32
    %c0_i32_1 = arith.constant 0 : i32
    %c0_i32_2 = arith.constant 0 : i32
    return %arg0, %c0_i32, %c0_i32_0, %c0_i32_1 : i32, i32, i32, i32
  }
}

</mosaic_0001>

<bundles_post_ra>
// kernel: tpu_custom_call.1
= control target key start
LH: loop header
LB: loop body
LE: loop exit
PB: predicated region body
PF: predicated region fallthrough
CT: control target
= control target key end

     0   :  { %s1719_s18 = smov 0   ;;  %s2071_s0 = inlined_call_operand.vmem [shape: bf16[2,10,10,5], index: 0, kind: input, shape index: {}]   ;;  %s2072_s1 = inlined_call_operand.vmem [shape: f32[1,5], index: 1, kind: input, shape index: {}]   ;;  %s2073_s2 = inlined_call_operand.vmem [shape: f32[1,5], index: 2, kind: input, shape index: {}]   ;;  %s2074_s3 = inlined_call_operand.vmem [shape: bf16[9,5,7], index: 3, kind: input, shape index: {}]   ;;  %s2075_s4 = inlined_call_operand.vmem [shape: f32[1,7], index: 4, kind: input, shape index: {}]   ;;  %s2076_s5 = inlined_call_operand.vmem [shape: bf16[2,8,8,7], index: 5, kind: output, shape index: {}]  }
   0x1 LB: > { %s1367_s1 = sadd.s32 4294967295, %s1686_s18   ;;  %p1371_p0 = scmp.ge.s32.totalorder %s1686_s18, 1  ;;  %s1686_s18 = sphi %s1719_s18, %s15_s18  }
   0x2   : > { %p187_p1 = scmp.lt.s32.totalorder %s1686_s18, 3 }
   0x4   : > { %p188_p2 = pnand %p1371_p0, %p187_p1 }
   0x5   : > { %v1375_v0 = vld [vmem:[%s2074_s3 + $0x4] sm:$0x7] (!%p188_p2)  ;;  %vm389_vm0 = vcmask (!%p188_p2), 1041408   ;;  %vm390_vm1 = vcmask (!%p188_p2), 1042432   ;;  %v1688_v1 = vmov (!%p188_p2), 65535   ;;  %p215_p3 = scmp.lt.s32.totalorder (!%p188_p2), %s1367_s1, 1 }
   0x6   : > { %191 = sbr.rel (%p188_p2) target bundleno = 327 (0x147), region = 40  ;;  %v391_v2 = vsel (!%p188_p2), %vm389_vm0, 4294967295, %v1688_v1  ;;  %v1418_v3 = vld [vmem:[%s2074_s3 + $0x10] sm:$0x7] (!%p188_p2)  ;;  %v246_v5 = vld [vmem:[%s2074_s3] sm:$0x7] (!%p188_p2) }
   0x7   : > { %v1734_v4 = vsel (!%p188_p2), %vm390_vm1, %v391_v2, 0  ;;  %v1428_v9 = vld [vmem:[%s2074_s3 + $0x14] sm:$0x7] (!%p188_p2)  ;;  %vm247_vm2 = vsmask.f32 (!%p188_p2), 3328  ;;  %vm376_vm4 = vcmask (!%p188_p2), 39936  }
   0x8   : > { %v394_v6 = vand.u32 (!%p188_p2), %v1375_v0, %v1734_v4  ;;  %v1741_v7 = vand.u32 (!%p188_p2), %v1418_v3, %v1734_v4  ;;  %v1746_v8 = vand.u32 (!%p188_p2), %v1734_v4, %v246_v5  ;;  %v1752_v10 = vand.u32 (!%p188_p2), %v1428_v9, %v1734_v4  ;;  %v1437_v11 = vld [vmem:[%s2074_s3 + $0x18] sm:$0x7] (!%p188_p2)  ;;  %v1400_v12 = vld [vmem:[%s2074_s3 + $0x8] sm:$0x7] (!%p188_p2) }
   0x9   : > { %vm248_vm3 = vsmask.f32 (!%p188_p2), 7440  ;;  %v1802_v33 = vand.u32 (!%p188_p2), %v1437_v11, %v1734_v4  ;;  %v1805_v34 = vand.u32 (!%p188_p2), %v1400_v12, %v1734_v4  ;;  %vm570_vm6 = vcmask (!%p188_p2), 1046532  }
   0xa   : > { %1505 = vmatprep.subr.bf16.mxu1 (!%p188_p2), %v394_v6  ;;  %1545 = vmatprep.subr.bf16.mxu0 (!%p188_p2), %v1741_v7  ;;  %vm1811_vm5 = vmor (!%p188_p2), %vm247_vm2, %vm248_vm3  ;;  %vm1303_vm8 = vcmask (!%p188_p2), 52224  }
   0xb   : > { %1506 = vmatpush3.bf16.msra.mxu1 (!%p188_p2), %v394_v6  ;;  %1546 = vmatpush3.bf16.msra.mxu0 (!%p188_p2), %v1741_v7  ;;  %vm1877_vm7 = vmor (!%p188_p2), %vm390_vm1, %vm570_vm6 }
   0xc   : > { %1515 = vmatprep.subr.bf16.mxu1 (!%p188_p2), %v1746_v8  ;;  %1555 = vmatprep.subr.bf16.mxu0 (!%p188_p2), %v1752_v10 }
   0xd   : > { %s2082_s1 = smov (!%p215_p3, %s1367_s1), 1 }
   0xe   : > { %s1661_s26 = smul.u32 80, %s2082_s1  ;;  %s1459_s17 = sshll.u32 %s2082_s1, 5 }
   0xf   : > { %s2050_s20 = scalar_lea.vmem %s2076_s5, %s1459_s17 }
  0x10   : > { %s1760_s29 = scalar_lea.vmem %s2071_s0, %s1661_s26 }
  0x11   : > { %v1771_v13 = vld [vmem:[%s1760_s29] sm:$0xf]  ;;  %v1774_v14 = vld [vmem:[%s1760_s29 + $0x4] sm:$0x1]  ;;  %v1777_v15 = vld [vmem:[%s1760_s29 + $0x8] sm:$0xf] }
  0x12   : > { %v1780_v16 = vld [vmem:[%s1760_s29 + $0xc] sm:$0x1]  ;;  %v251_v17 = vshrl.u32 %v1771_v13, 16  ;;  %v254_v18 = vshll.u32 %v1771_v13, 16  ;;  %v260_v19 = vshll.u32 %v1774_v14, 16  ;;  %v265_v20 = vshrl.u32 %v1777_v15, 16 }
  0x13   : > { %v268_v21 = vshll.u32 %v1777_v15, 16  ;;  %v274_v22 = vshll.u32 %v1780_v16, 16  ;;  %v1789_v23 = vld [vmem:[%s1760_s29 + $0x10] sm:$0xf]  ;;  %v578_v27 = vrot.slane %v1780_v16, 5  ;;  %v1384_v16 = vcombine.low %v1771_v13, %v1777_v15 }
  0x14   : > { %v253_v24 = vrot.slane %v251_v17, 4  ;;  %v256_v25 = vrot.slane %v254_v18, 5  ;;  %v267_v26 = vrot.slane %v265_v20, 4  ;;  %v1793_v28 = vld [vmem:[%s1760_s29 + $0x14] sm:$0x1]  ;;  %v262_v29 = vrot.slane %v260_v19, 5 }
  0x15   : > { %v270_v30 = vrot.slane %v268_v21, 5  ;;  %v1796_v31 = vld [vmem:[%s1760_s29 + $0x18] sm:$0xf]  ;;  %v1799_v32 = vld [vmem:[%s1760_s29 + $0x1c] sm:$0x1]  ;;  %v276_v36 = vrot.slane %v274_v22, 5 }
  0x16   : > { %v257_v35 = vor.u32 %v256_v25, %v253_v24  ;;  %v279_v37 = vshrl.u32 %v1789_v23, 16  ;;  %v282_v38 = vshll.u32 %v1789_v23, 16  ;;  %v1816_v41 = vld [vmem:[%s1760_s29 + $0x20] sm:$0xf]  ;;  %v288_v42 = vshll.u32 %v1793_v28, 16 }
  0x17   : > { %v271_v40 = vor.u32 %v270_v30, %v267_v26  ;;  %v293_v43 = vshrl.u32 %v1796_v31, 16  ;;  %v296_v44 = vshll.u32 %v1796_v31, 16  ;;  %v1822_v46 = vld [vmem:[%s1760_s29 + $0x24] sm:$0x1]  ;;  %v302_v49 = vshll.u32 %v1799_v32, 16 }
  0x18   : > { %v258_v45 = vrot.slane %v257_v35, 4  ;;  %v281_v47 = vrot.slane %v279_v37, 4  ;;  %v284_v48 = vrot.slane %v282_v38, 5  ;;  %v290_v51 = vrot.slane %v288_v42, 5  ;;  %v1833_v62 = vld [vmem:[%s1760_s29 + $0x28] sm:$0xf] }
  0x19   : > { %v272_v50 = vrot.slane %v271_v40, 4  ;;  %v295_v52 = vrot.slane %v293_v43, 4  ;;  %v298_v53 = vrot.slane %v296_v44, 5  ;;  %v304_v56 = vrot.slane %v302_v49, 5  ;;  %v1837_v3 = vld [vmem:[%s1760_s29 + $0x2c] sm:$0x1] }
  0x1a   : > { %v263_v54 = vsel %vm1811_vm5, %v258_v45, %v262_v29  ;;  %v285_v55 = vor.u32 %v284_v48, %v281_v47  ;;  %v307_v57 = vshrl.u32 %v1816_v41, 16  ;;  %v310_v60 = vshll.u32 %v1816_v41, 16  ;;  %v1841_v12 = vld [vmem:[%s1760_s29 + $0x30] sm:$0xf]  ;;  %v1850_v21 = vld [vmem:[%s1760_s29 + $0x34] sm:$0x1] }
  0x1b   : > { %v277_v58 = vsel %vm1811_vm5, %v272_v50, %v276_v36  ;;  %v299_v59 = vor.u32 %v298_v53, %v295_v52  ;;  %v316_v61 = vshll.u32 %v1822_v46, 16  ;;  %v582_v2 = vrot.slane %v1793_v28, 5  ;;  %v1856_v28 = vld [vmem:[%s1760_s29 + $0x38] sm:$0xf]  ;;  %v1861_v36 = vld [vmem:[%s1760_s29 + $0x3c] sm:$0x1] }
  0x1c   : > { %v1376_v63 = vcombine.low %v263_v54, %v277_v58  ;;  %v286_v0 = vrot.slane %v285_v55, 4  ;;  %v309_v1 = vrot.slane %v307_v57, 4  ;;  %v312_v6 = vrot.slane %v310_v60, 5 }
  0x1d   : > { %v300_v5 = vrot.slane %v299_v59, 4  ;;  %v318_v9 = vrot.slane %v316_v61, 5  ;;  %v586_v11 = vrot.slane %v1799_v32, 5  ;;  %v590_v18 = vrot.slane %v1822_v46, 5  ;;  %v1443_v32 = vld [vmem:[%s2074_s3 + $0x1c] sm:$0x7] }
  0x1e   : > { %1507 = vmatprep.mubr.msk.bf16.mxu1 %vm376_vm4, %v1376_v63  ;;  %v291_v17 = vsel %vm1811_vm5, %v286_v0, %v290_v51  ;;  %v321_v19 = vshrl.u32 %v1833_v62, 16  ;;  %v324_v20 = vshll.u32 %v1833_v62, 16  ;;  %v313_v24 = vor.u32 %v312_v6, %v309_v1 }
  0x1f   : > { %v305_v22 = vsel %vm1811_vm5, %v300_v5, %v304_v56  ;;  %v1419_v25 = vcombine.low %v277_v58, %v291_v17  ;;  %v330_v26 = vshll.u32 %v1837_v3, 16  ;;  %v335_v37 = vshrl.u32 %v1841_v12, 16 }
  0x20   : > { %v1858_v29 = vcombine.low %v291_v17, %v305_v22  ;;  %v323_v30 = vrot.slane %v321_v19, 4  ;;  %v326_v35 = vrot.slane %v324_v20, 5  ;;  %v314_v38 = vrot.slane %v313_v24, 4 }
  0x21   : > { %1547 = vmatprep.mubr.msk.bf16.mxu0 %vm376_vm4, %v1419_v25  ;;  %v332_v40 = vrot.slane %v330_v26, 5  ;;  %v338_v42 = vshll.u32 %v1841_v12, 16  ;;  %v344_v43 = vshll.u32 %v1850_v21, 16  ;;  %v337_v45 = vrot.slane %v335_v37, 4  ;;  %v1938_v37 = vld [vmem:[%s1760_s29 + $0x40] sm:$0xf] }
  0x22   : > { %1508 = vmatmul.mubr.msk.bf16.vlgmr.msra.gmra.mrb[0].mxu1 %vm376_vm4, %v1858_v29  ;;  %v327_v44 = vor.u32 %v326_v35, %v323_v30  ;;  %v349_v47 = vshrl.u32 %v1856_v28, 16  ;;  %v352_v48 = vshll.u32 %v1856_v28, 16  ;;  %v319_v49 = vsel %vm1811_vm5, %v314_v38, %v318_v9  ;;  %v1941_v38 = vld [vmem:[%s1760_s29 + $0x44] sm:$0x1] }
  0x23   : > { %1516 = vmatpush3.bf16.msra.mxu1 %v1746_v8  ;;  %v340_v50 = vrot.slane %v338_v42, 5  ;;  %v346_v51 = vrot.slane %v344_v43, 5  ;;  %v358_v52 = vshll.u32 %v1861_v36, 16  ;;  %v1420_v54 = vcombine.low %v305_v22, %v319_v49 }
  0x24   : > { %v328_v55 = vrot.slane %v327_v44, 4  ;;  %v351_v56 = vrot.slane %v349_v47, 4  ;;  %v354_v57 = vrot.slane %v352_v48, 5  ;;  %1525 = vmatprep.subr.bf16.mxu1 %v1805_v34  ;;  %v1393_v8 = vrot.slane %v1777_v15, 9  ;;  %v1409_v44 = vld [vmem:[%s2074_s3 + $0xc] sm:$0x7] }
  0x25   : > { %v341_v58 = vor.u32 %v340_v50, %v337_v45  ;;  %v360_v59 = vrot.slane %v358_v52, 5  ;;  %v1394_v60 = vrot.slane %v1789_v23, 9  ;;  %1548 = vmatmul.mubr.msk.bf16.vlgmr.msra.gmra.mrb[0].mxu0 %vm376_vm4, %v1420_v54  ;;  %v1395_v0 = vrot.slane %v1796_v31, 9  ;;  %v244_v54 = vld [vmem:[%s1760_s29 + $0x48] sm:$0xf] }
  0x26   : > { %v1887_v61 = vsel %vm1811_vm5, %v328_v55, %v332_v40  ;;  %v355_v63 = vor.u32 %v354_v57, %v351_v56  ;;  %v1396_v1 = vrot.slane %v1816_v41, 9  ;;  %1556 = vmatpush3.bf16.msra.mxu0 %v1752_v10  ;;  %v579_v9 = vsel %vm1877_vm7, %v1393_v8, %v578_v27  ;;  %v245_v55 = vld [vmem:[%s1760_s29 + $0x4c] sm:$0x1] }
  0x27   : > { %v1893_v5 = vcombine.low %v319_v49, %v1887_v61  ;;  %v342_v6 = vrot.slane %v341_v58, 4  ;;  %v583_v17 = vsel %vm1877_vm7, %v1394_v60, %v582_v2  ;;  %1565 = vmatprep.subr.bf16.mxu0 %v1802_v33  ;;  %v1397_v27 = vrot.slane %v1833_v62, 9 }
  0x28   : > { %v356_v19 = vrot.slane %v355_v63, 4  ;;  %v1429_v20 = vcombine.low %v579_v9, %v583_v17  ;;  %v594_v22 = vrot.slane %v1837_v3, 5  ;;  %v1398_v24 = vrot.slane %v1841_v12, 9 }
  0x29   : > { %1511 = vmatprep.mubr.msk.bf16.mxu1 %vm376_vm4, %v1893_v5  ;;  %v1906_v10 = vsel %vm1811_vm5, %v342_v6, %v346_v51  ;;  %v598_v25 = vrot.slane %v1850_v21, 5  ;;  %v587_v30 = vsel %vm1877_vm7, %v1395_v0, %v586_v11  ;;  %v591_v35 = vsel %vm1877_vm7, %v1396_v1, %v590_v18 }
  0x2a   : > { %v1913_v2 = vsel %vm1811_vm5, %v356_v19, %v360_v59  ;;  %1557 = vmatprep.mubr.msk.bf16.mxu0 %vm376_vm4, %v1429_v20  ;;  %v595_v3 = vsel %vm1877_vm7, %v1397_v27, %v594_v22  ;;  %v1430_v46 = vcombine.low %v587_v30, %v591_v35  ;;  %v1399_v11 = vrot.slane %v1856_v28, 9 }
  0x2b   : > { %v1921_v26 = vcombine.low %v1906_v10, %v1913_v2  ;;  %v1935_v21 = vsel %vm1877_vm7, %v1398_v24, %v598_v25  ;;  %v602_v40 = vrot.slane %v1861_v36, 5  ;;  %v1427_v42 = vrot.slane %v1938_v37, 9 }
  0x2c   : > { %v1431_v18 = vcombine.low %v595_v3, %v1935_v21  ;;  %v914_v43 = vrot.slane %v1941_v38, 5  ;;  %v1117_v45 = vand.u32 %v1443_v32, %v1734_v4  ;;  %v1385_v47 = vcombine.low %v1789_v23, %v1796_v31 }
  0x2d   : > { %1512 = vmatmul.mubr.msk.bf16.gmra.mrb[4].mxu1 %vm376_vm4, %v1921_v26  ;;  %v1386_v48 = vcombine.low %v1816_v41, %v1833_v62  ;;  %v727_v36 = vand.u32 %v1409_v44, %v1734_v4  ;;  %v574_v49 = vrot.slane %v1774_v14, 5  ;;  %v603_v50 = vsel %vm1877_vm7, %v1399_v11, %v602_v40 }
  0x2e   : > { %1517 = vmatprep.mubr.msk.bf16.mxu1 %vm376_vm4, %v1384_v16  ;;  %v1971_v51 = vsel %vm1877_vm7, %v1427_v42, %v914_v43  ;;  %v1392_v52 = vrot.slane %v1771_v13, 9  ;;  %v1449_v56 = vrot.slane %v244_v54, 9  ;;  %v1195_v57 = vrot.slane %v245_v55, 5 }
  0x2f   : > { %v1432_v14 = vcombine.low %v603_v50, %v1971_v51  ;;  %v1387_v58 = vcombine.low %v1841_v12, %v1856_v28  ;;  %v1402_v8 = vcombine.low %v583_v17, %v587_v30  ;;  %v1403_v60 = vcombine.low %v591_v35, %v595_v3 }
  0x30   : > { %v575_v13 = vsel %vm1877_vm7, %v1392_v52, %v574_v49  ;;  %v1096_v63 = vshrl.u32 %v244_v54, 16  ;;  %v1099_v0 = vshll.u32 %v244_v54, 16  ;;  %v803_v1 = vshrl.u32 %v1938_v37, 16 }
  0x31   : > { %1558 = vmatmul.mubr.msk.bf16.vlgmr.msra.gmra.mrb[0].mxu0 %vm376_vm4, %v1430_v46  ;;  %v1401_v59 = vcombine.low %v575_v13, %v579_v9  ;;  %v806_v6 = vshll.u32 %v1938_v37, 16  ;;  %v1438_v9 = vcombine.low %v1938_v37, %v244_v54  ;;  %v1404_v16 = vcombine.low %v1935_v21, %v603_v50 }
  0x32   : > { %1566 = vmatpush3.bf16.msra.mxu0 %v1802_v33  ;;  %1561 = vmatprep.mubr.msk.bf16.mxu0 %vm376_vm4, %v1431_v18  ;;  %v1982_v33 = vsel %vm1877_vm7, %v1449_v56, %v1195_v57  ;;  %v1098_v19 = vrot.slane %v1096_v63, 4  ;;  %v1101_v20 = vrot.slane %v1099_v0, 5  ;;  %v1410_v27 = vcombine.low %v1777_v15, %v1789_v23 }
  0x33   : > { %1575 = vmatprep.subr.bf16.mxu0 %v1117_v45  ;;  %v808_v17 = vrot.slane %v806_v6, 5  ;;  %v812_v24 = vshll.u32 %v1941_v38, 16  ;;  %v1105_v30 = vshll.u32 %v245_v55, 16  ;;  %v1411_v46 = vcombine.low %v1796_v31, %v1816_v41 }
  0x34   : > { %v1102_v25 = vor.u32 %v1101_v20, %v1098_v19  ;;  %v1412_v15 = vcombine.low %v1833_v62, %v1841_v12  ;;  %v1413_v41 = vcombine.low %v1856_v28, %v1938_v37  ;;  %v1421_v62 = vcombine.low %v1887_v61, %v1906_v10 }
  0x35   : > { %1518 = vmatmul.mubr.msk.bf16.vlgmr.msra.gmra.mrb[0].mxu1 %vm376_vm4, %v1385_v47  ;;  %v814_v3 = vrot.slane %v812_v24, 5  ;;  %v1107_v32 = vrot.slane %v1105_v30, 5  ;;  %v1451_v39 = vcombine.low %v1971_v51, %v1982_v33 }
  0x36   : > { %1526 = vmatpush3.bf16.msra.mxu1 %v1805_v34  ;;  %1521 = vmatprep.mubr.msk.bf16.mxu1 %vm376_vm4, %v1386_v48  ;;  %v1450_v34 = vld [vmem:[%s2074_s3 + $0x20] sm:$0x7]  ;;  %v1103_v21 = vrot.slane %v1102_v25, 4 }
  0x37   : > { %1535 = vmatprep.subr.bf16.mxu1 %v727_v36  ;;  %v1205_v53 = vand.u32 %v1450_v34, %v1734_v4  ;;  %v805_v4 = vrot.slane %v803_v1, 4 }
  0x39   : > { %1562 = vmatmul.mubr.msk.bf16.gmra.mrb[4].mxu0 %vm376_vm4, %v1432_v14  ;;  %v809_v22 = vor.u32 %v808_v17, %v805_v4 }
  0x3a   : > { %1567 = vmatprep.mubr.msk.bf16.mxu0 %vm376_vm4, %v1385_v47 }
  0x3b   : > { %v810_v35 = vrot.slane %v809_v22, 4 }
  0x3d   : > { %1522 = vmatmul.mubr.msk.bf16.gmra.mrb[4].mxu1 %vm376_vm4, %v1387_v58  ;;  %v815_v23 = vsel %vm1811_vm5, %v810_v35, %v814_v3 }
  0x3e   : > { %1527 = vmatprep.mubr.msk.bf16.mxu1 %vm376_vm4, %v1401_v59 }
  0x41   : > { %1568 = vmatmul.mubr.msk.bf16.vlgmr.msra.gmra.mrb[0].mxu0 %vm376_vm4, %v1386_v48 }
  0x42   : > { %1576 = vmatpush3.bf16.msra.mxu0 %v1117_v45  ;;  %1571 = vmatprep.mubr.msk.bf16.mxu0 %vm376_vm4, %v1387_v58 }
  0x43   : > { %1585 = vmatprep.subr.bf16.mxu0 %v1205_v53 }
  0x45   : > { %1528 = vmatmul.mubr.msk.bf16.vlgmr.msra.gmra.mrb[0].mxu1 %vm376_vm4, %v1402_v8 }
  0x46   : > { %1536 = vmatpush3.bf16.msra.mxu1 %v727_v36  ;;  %1531 = vmatprep.mubr.msk.bf16.mxu1 %vm376_vm4, %v1403_v60 }
  0x47   : > { %1595 = vmatprep.subr.bf16.mxu1 %v1741_v7 }
  0x49   : > { %1572 = vmatmul.mubr.msk.bf16.gmra.mrb[4].mxu0 %vm376_vm4, %v1438_v9 }
  0x4a   : > { %1577 = vmatprep.mubr.msk.bf16.mxu0 %vm376_vm4, %v1858_v29  ;;  %v1108_v29 = vsel %vm1811_vm5, %v1103_v21, %v1107_v32 }
  0x4b   : > { %v1444_v31 = vcombine.low %v815_v23, %v1108_v29 }
  0x4d   : > { %1532 = vmatmul.mubr.msk.bf16.gmra.mrb[4].mxu1 %vm376_vm4, %v1404_v16 }
  0x4e   : > { %1537 = vmatprep.mubr.msk.bf16.mxu1 %vm376_vm4, %v1410_v27 }
  0x51   : > { %1578 = vmatmul.mubr.msk.bf16.vlgmr.msra.gmra.mrb[0].mxu0 %vm376_vm4, %v1893_v5 }
  0x52   : > { %1586 = vmatpush3.bf16.msra.mxu0 %v1205_v53  ;;  %1581 = vmatprep.mubr.msk.bf16.mxu0 %vm376_vm4, %v1921_v26  ;;  %v1456_v26 = vld [vmem:[%s2075_s4] ss:$0 sm:$0xff] }
  0x55   : > { %1538 = vmatmul.mubr.msk.bf16.vlgmr.msra.gmra.mrb[0].mxu1 %vm376_vm4, %v1411_v46 }
  0x56   : > { %1596 = vmatpush3.bf16.msra.mxu1 %v1741_v7  ;;  %1541 = vmatprep.mubr.msk.bf16.mxu1 %vm376_vm4, %v1412_v15  ;;  %v1422_v7 = vcombine.low %v1913_v2, %v815_v23 }
  0x59   : > { %1582 = vmatmul.mubr.msk.bf16.gmra.mrb[4].mxu0 %vm376_vm4, %v1444_v31 }
  0x5a   : > { %1587 = vmatprep.mubr.msk.bf16.mxu0 %vm376_vm4, %v1402_v8 }
  0x5d   : > { %1542 = vmatmul.mubr.msk.bf16.gmra.mrb[4].mxu1 %vm376_vm4, %v1413_v41 }
  0x5e   : > { %1551 = vmatprep.mubr.msk.bf16.mxu1 %vm376_vm4, %v1421_v62 }
  0x61   : > { %1588 = vmatmul.mubr.msk.bf16.vlgmr.msra.gmra.mrb[0].mxu0 %vm376_vm4, %v1403_v60 }
  0x62   : > { %1591 = vmatprep.mubr.msk.bf16.mxu0 %vm376_vm4, %v1404_v16 }
  0x69   : > { %1552 = vmatmul.mubr.msk.bf16.vlgmr.msra.gmra.mrb[4].mxu1 %vm376_vm4, %v1422_v7  ;;  %1592 = vmatmul.mubr.msk.bf16.gmra.mrb[4].mxu0 %vm376_vm4, %v1451_v39 }
 0x128   : > { %v1539_v12 = vpop.f32.mrb[0].mxu1 }
 0x129   : > { %v763_v28 = vpop.f32.mrb[1].mxu1 }
 0x12a   : > { %v1540_v61 = vpop.f32.mrb[2].mxu1 }
 0x12b   : > { %v766_v5 = vpop.f32.mrb[3].mxu1 }
 0x134   : > { %v1589_v10 = vpop.f32.mrb[0].mxu0 }
 0x135   : > { %v1597_v37 = vadd.f32 %v1589_v10, %v1539_v12  ;;  %v1241_v38 = vpop.f32.mrb[1].mxu0 }
 0x136   : > { %v1598_v2 = vadd.f32 %v1241_v38, %v763_v28  ;;  %v1590_v11 = vpop.f32.mrb[2].mxu0 }
 0x137   : > { %v1289_v18 = vadd.f32 %v1597_v37, %v1456_v26  ;;  %v1599_v40 = vadd.f32 %v1590_v11, %v1540_v61  ;;  %v1244_v42 = vpop.f32.mrb[3].mxu0 }
 0x138   : > { %v1287_v43 = vadd.f32 %v1598_v2, %v1456_v26  ;;  %v1600_v44 = vadd.f32 %v1244_v42, %v766_v5 }
 0x139   : > { %v1297_v45 = vpack.c.bf16 %v1289_v18, %v1289_v18  ;;  %v1290_v47 = vadd.f32 %v1599_v40, %v1456_v26 }
 0x13a   : > { %v1295_v48 = vpack.c.bf16 %v1287_v43, %v1287_v43  ;;  %v1288_v36 = vadd.f32 %v1600_v44, %v1456_v26 }
 0x13b   : > { %1306 = vst.msk [vmem:[%s2050_s20 + $0x8] sm:$0xf] %vm1303_vm8, %v1297_v45  ;;  %v1298_v49 = vpack.c.bf16 %v1290_v47, %v1290_v47 }
 0x13c   : > { %v1553_v50 = vpop.f32.mrb[4].mxu1  ;;  %1304 = vst.msk [vmem:[%s2050_s20] sm:$0xf] %vm1303_vm8, %v1295_v48  ;;  %v1296_v51 = vpack.c.bf16 %v1288_v36, %v1288_v36  ;;  %v1593_v52 = vpop.f32.mrb[4].mxu0 }
 0x13d   : > { %v888_v54 = vpop.f32.mrb[5].mxu1  ;;  %1307 = vst.msk [vmem:[%s2050_s20 + $0xc] sm:$0xf] %vm1303_vm8, %v1298_v49  ;;  %v1601_v55 = vadd.f32 %v1593_v52, %v1553_v50  ;;  %v1257_v56 = vpop.f32.mrb[5].mxu0 }
 0x13e   : > { %v1554_v57 = vpop.f32.mrb[6].mxu1  ;;  %1305 = vst.msk [vmem:[%s2050_s20 + $0x4] sm:$0xf] %vm1303_vm8, %v1296_v51  ;;  %v1602_v14 = vadd.f32 %v1257_v56, %v888_v54  ;;  %v1594_v33 = vpop.f32.mrb[6].mxu0 }
 0x13f   : > { %v891_v13 = vpop.f32.mrb[7].mxu1  ;;  %v1293_v58 = vadd.f32 %v1601_v55, %v1456_v26  ;;  %v1603_v59 = vadd.f32 %v1594_v33, %v1554_v57  ;;  %v1260_v34 = vpop.f32.mrb[7].mxu0 }
 0x140   : > { %v1291_v53 = vadd.f32 %v1602_v14, %v1456_v26  ;;  %v1604_v8 = vadd.f32 %v1260_v34, %v891_v13 }
 0x141   : > { %v1301_v60 = vpack.c.bf16 %v1293_v58, %v1293_v58  ;;  %v1294_v63 = vadd.f32 %v1603_v59, %v1456_v26 }
 0x142   : > { %v1299_v0 = vpack.c.bf16 %v1291_v53, %v1291_v53  ;;  %v1292_v1 = vadd.f32 %v1604_v8, %v1456_v26 }
 0x143   : > { %1310 = vst.msk [vmem:[%s2050_s20 + $0x18] sm:$0xf] %vm1303_vm8, %v1301_v60  ;;  %v1302_v6 = vpack.c.bf16 %v1294_v63, %v1294_v63 }
 0x144   : > { %1308 = vst.msk [vmem:[%s2050_s20 + $0x10] sm:$0xf] %vm1303_vm8, %v1299_v0  ;;  %v1300_v9 = vpack.c.bf16 %v1292_v1, %v1292_v1 }
 0x145   : > { %1311 = vst.msk [vmem:[%s2050_s20 + $0x1c] sm:$0xf] %vm1303_vm8, %v1302_v6 }
 0x146   : > { %1309 = vst.msk [vmem:[%s2050_s20 + $0x14] sm:$0xf] %vm1303_vm8, %v1300_v9 }
 0x147 PF: > { %s15_s18 = sadd.s32 1, %s1686_s18  }
 0x148   : > { %p12_p4 = scmp.ge.s32.totalorder %s15_s18, 4  }
 0x14a   :  { %14 = sbr.rel (!%p12_p4) target bundleno = 1 (0x1), region = 78 }

</bundles_post_ra>
